<compile_context>
chip_gen: v7x
topology: tpu7x:2x2x1
jax: 0.10.0
libtpu: 0.0.40
codegen_flags: <defaults>
</compile_context>

<pallas_src>
import jax
import jax.numpy as jnp
from jax import lax
from jax.experimental import pallas as pl
from jax.experimental.pallas import tpu as pltpu


def _round_up(x, m):
    return ((x + m - 1) // m) * m


def bert_mlm_kernel(x_ref, w1t_ref, b1_ref, gamma_ref, beta_ref,
                    w2t_ref, b2_ref, out_ref, h_ref):
    # x_ref:     (TM, H)   row tile of flattened hidden states
    # w1t_ref:   (H, H)    dense weight, pre-transposed to (in, out)
    # b1_ref:    (1, H)
    # gamma_ref: (1, H)    layer-norm scale
    # beta_ref:  (1, H)    layer-norm shift
    # w2t_ref:   (H, TN)   vocab tile of decoder weight, (in, out) layout
    # b2_ref:    (1, TN)
    # out_ref:   (TM, TN)
    # h_ref:     (TM, H)   VMEM scratch: cached dense+GELU+LayerNorm result

    # --- Compute the row-tile intermediate once (first vocab step only). ---
    @pl.when(pl.program_id(1) == 0)
    def _():
        x = x_ref[...]
        # dense: x @ W1^T (W1 already transposed -> plain (M,K)@(K,N) on MXU,
        # f32 accumulation)
        h = jnp.dot(x, w1t_ref[...], preferred_element_type=jnp.float32)
        h = h + b1_ref[...].astype(jnp.float32)

        # exact GELU (erf-based, torch.nn.functional.gelu default)
        inv_sqrt2 = jnp.float32(0.7071067811865476)
        h = 0.5 * h * (1.0 + lax.erf(h * inv_sqrt2))

        # LayerNorm over last dim (eps = 1e-5, nn.LayerNorm default), in f32
        mean = jnp.mean(h, axis=-1, keepdims=True)
        centered = h - mean
        var = jnp.mean(centered * centered, axis=-1, keepdims=True)
        inv_std = lax.rsqrt(var + jnp.float32(1e-5))
        h = (centered * inv_std * gamma_ref[...].astype(jnp.float32)
             + beta_ref[...].astype(jnp.float32))

        # Cache in the decoder's compute dtype so the second matmul feeds the
        # MXU with matching (e.g. bf16) operands without per-step casts.
        h_ref[...] = h.astype(h_ref.dtype)

    # --- Decoder for this vocab tile: h @ W2_tile^T + b2_tile ---
    y = jnp.dot(h_ref[...], w2t_ref[...], preferred_element_type=jnp.float32)
    y = y + b2_ref[...].astype(jnp.float32)
    out_ref[...] = y.astype(out_ref.dtype)


def _vmem_budget_bytes():
    """Generation-aware VMEM budget with ~15% headroom for compiler scratch."""
    try:
        info = pltpu.get_tpu_info()
        cap = getattr(info, "vmem_capacity_bytes", None)
        if cap:
            return int(cap * 0.85)
    except Exception:
        pass
    # Conservative fallback sized for the smallest generation (v7x: 64 MiB).
    return int((64 << 20) * 0.85)


def bert_mlm_forward(x, w1, b1, gamma, beta, w2, b2, *, tm=1024, tn=1024,
                     out_dtype=None):
    """x: [B, S, H] -> logits [B, S, V].

    w1: (H, H), b1: (H,)     -- nn.Linear(hidden, hidden), (out, in) layout
    gamma/beta: (H,)         -- nn.LayerNorm(hidden)
    w2: (V, H), b2: (V,)     -- nn.Linear(hidden, vocab),  (out, in) layout
    """
    B, S, H = x.shape
    V = w2.shape[0]
    rows = B * S
    if out_dtype is None:
        out_dtype = x.dtype

    isz = jnp.dtype(x.dtype).itemsize
    wsz = jnp.dtype(w2.dtype).itemsize
    osz = jnp.dtype(out_dtype).itemsize

    # --- Tile sizing ---------------------------------------------------------
    # dtype-dependent minimum sublane multiple (f32: 8, bf16: 16, int8/fp8: 32)
    sub = max(8, 32 // isz)
    assert tn % 128 == 0, "tn must be a multiple of 128"

    tm_eff = min(tm, _round_up(rows, sub))
    tm_eff = _round_up(tm_eff, sub)
    # v7x megacore balance: keep >= 2 row tiles along the "parallel" axis when
    # the row count allows it (1 TC on v5e/v6e -> harmless there).
    if rows >= 2 * sub:
        tm_eff = min(tm_eff, _round_up(pl.cdiv(rows, 2), sub))

    tn_eff = min(tn, _round_up(V, 128))

    def vmem_estimate(tm_, tn_):
        return (2 * tm_ * H * isz           # x tiles (double-buffered)
                + 2 * H * H * wsz           # W1^T (conservative: 2 buffers)
                + 2 * H * tn_ * wsz         # W2^T vocab tiles
                + 2 * tm_ * tn_ * osz       # output tiles
                + tm_ * H * wsz             # h scratch
                + 4 * tm_ * H * 4           # f32 intermediates in j==0 branch
                + (2 << 20))                # biases / LN params / slack

    budget = _vmem_budget_bytes()
    # Auto-shrink tiles if they would not fit the generation's VMEM budget.
    while vmem_estimate(tm_eff, tn_eff) > budget:
        if tn_eff > 512:
            tn_eff = max(512, tn_eff // 2)
        elif tm_eff > 256:
            tm_eff = max(256, _round_up(tm_eff // 2, sub))
        else:
            break

    rows_pad = _round_up(rows, tm_eff)
    v_pad = _round_up(V, tn_eff)

    # --- Prepare operands ----------------------------------------------------
    # One-time (amortized) transposes to (in, out) so both kernel matmuls are
    # plain (M,K)@(K,N) contractions with no per-step RHS relayout.
    x2 = x.reshape(rows, H)
    if rows_pad != rows:
        x2 = jnp.pad(x2, ((0, rows_pad - rows), (0, 0)))
    w1t = jnp.transpose(w1)                       # (H_in, H_out)
    w2t = jnp.transpose(w2)                       # (H, V)
    if v_pad != V:
        w2t = jnp.pad(w2t, ((0, 0), (0, v_pad - V)))
        b2_p = jnp.pad(b2, ((0, v_pad - V),))
    else:
        b2_p = b2

    b1_2 = b1.reshape(1, H)
    b2_2 = b2_p.reshape(1, v_pad)
    gamma_2 = gamma.reshape(1, H)
    beta_2 = beta.reshape(1, H)

    grid = (rows_pad // tm_eff, v_pad // tn_eff)

    est = vmem_estimate(tm_eff, tn_eff)
    vmem_limit = int(min(budget, max(est * 3 // 2, 32 << 20)))

    def build_call(single_buffer_consts):
        # Constant-index operands never change across the grid; single-buffer
        # them to reclaim VMEM (funds larger tm/tn, esp. on v7x's 64 MiB).
        const_kw = ({"pipeline_mode": pl.Buffered(1)}
                    if single_buffer_consts else {})
        in_specs = [
            pl.BlockSpec((tm_eff, H), lambda i, j: (i, 0)),           # x tile
            pl.BlockSpec((H, H), lambda i, j: (0, 0), **const_kw),    # W1^T
            pl.BlockSpec((1, H), lambda i, j: (0, 0), **const_kw),    # b1
            pl.BlockSpec((1, H), lambda i, j: (0, 0), **const_kw),    # gamma
            pl.BlockSpec((1, H), lambda i, j: (0, 0), **const_kw),    # beta
            pl.BlockSpec((H, tn_eff), lambda i, j: (0, j)),           # W2^T
            pl.BlockSpec((1, tn_eff), lambda i, j: (0, j)),           # b2
        ]
        return pl.pallas_call(
            bert_mlm_kernel,
            out_shape=jax.ShapeDtypeStruct((rows_pad, v_pad), out_dtype),
            grid_spec=pltpu.PrefetchScalarGridSpec(
                num_scalar_prefetch=0,
                grid=grid,
                in_specs=in_specs,
                out_specs=pl.BlockSpec((tm_eff, tn_eff), lambda i, j: (i, j)),
                scratch_shapes=[pltpu.VMEM((tm_eff, H), w2.dtype)],
            ),
            compiler_params=pltpu.CompilerParams(
                dimension_semantics=("parallel", "arbitrary"),
                vmem_limit_bytes=vmem_limit),
        )

    args = (x2, w1t, b1_2, gamma_2, beta_2, w2t, b2_2)
    try:
        out = build_call(True)(*args)
    except Exception:
        # Fallback if this JAX build rejects pl.Buffered(1) single-buffering.
        out = build_call(False)(*args)

    # Only slice when padding was actually applied.  At production vocab
    # sizes, prefer keeping the padded logits and masking padded columns in
    # the downstream softmax/loss to avoid re-materializing the logits.
    if rows_pad != rows or v_pad != V:
        out = out[:rows, :V]
    return out.reshape(B, S, V)


def reference_forward(x, w1, b1, gamma, beta, w2, b2):
    """Pure-JAX reference mirroring the PyTorch module."""
    h = jnp.einsum("bsh,oh->bso", x, w1) + b1
    h = jax.nn.gelu(h, approximate=False)
    mean = jnp.mean(h, axis=-1, keepdims=True)
    var = jnp.mean((h - mean) ** 2, axis=-1, keepdims=True)
    h = (h - mean) / jnp.sqrt(var + 1e-5) * gamma + beta
    return jnp.einsum("bsh,vh->bsv", h, w2) + b2


if __name__ == "__main__":
    # Small shapes consistent with the module's forward.
    batch, seq, hidden, vocab = 2, 8, 128, 256

    key = jax.random.PRNGKey(0)
    k_x, k_w1, k_b1, k_g, k_be, k_w2, k_b2 = jax.random.split(key, 7)

    x = jax.random.normal(k_x, (batch, seq, hidden), dtype=jnp.float32)

    # Deterministic synthetic parameters (nn.Linear / nn.LayerNorm layouts).
    w1 = jax.random.normal(k_w1, (hidden, hidden), dtype=jnp.float32) * 0.02
    b1 = jax.random.normal(k_b1, (hidden,), dtype=jnp.float32) * 0.02
    gamma = 1.0 + 0.1 * jax.random.normal(k_g, (hidden,), dtype=jnp.float32)
    beta = 0.1 * jax.random.normal(k_be, (hidden,), dtype=jnp.float32)
    w2 = jax.random.normal(k_w2, (vocab, hidden), dtype=jnp.float32) * 0.02
    b2 = jax.random.normal(k_b2, (vocab,), dtype=jnp.float32) * 0.02

    # Demo stays in f32 for a tight tolerance; at production BERT scale feed
    # bf16 x/W1/W2 and out_dtype=jnp.bfloat16 (LayerNorm math stays f32).
    out = bert_mlm_forward(x, w1, b1, gamma, beta, w2, b2)
    out = jax.block_until_ready(out)

    ref = reference_forward(x, w1, b1, gamma, beta, w2, b2)
    assert out.shape == (batch, seq, vocab)
    assert jnp.allclose(out, ref, atol=1e-4, rtol=1e-4), \
        f"max abs err = {jnp.max(jnp.abs(out - ref))}"

    print("KERNEL_OK")
</pallas_src>

<mosaic_0001>
module attributes {stable_mosaic.version = 11 : i64} {
  func.func @bert_mlm_kernel(%arg0: i32, %arg1: i32, %arg2: memref<8x128xf32, #tpu.memory_space<vmem>>, %arg3: memref<128x128xf32, #tpu.memory_space<vmem>>, %arg4: memref<1x128xf32, #tpu.memory_space<vmem>>, %arg5: memref<1x128xf32, #tpu.memory_space<vmem>>, %arg6: memref<1x128xf32, #tpu.memory_space<vmem>>, %arg7: memref<128x256xf32, #tpu.memory_space<vmem>>, %arg8: memref<1x256xf32, #tpu.memory_space<vmem>>, %arg9: memref<8x256xf32, #tpu.memory_space<vmem>>, %arg10: memref<8x128xf32, #tpu.memory_space<vmem>>) attributes {dimension_semantics = [#tpu.dimension_semantics<parallel>, #tpu.dimension_semantics<arbitrary>], iteration_bounds = array<i64: 2, 1>, scalar_prefetch = 0 : i64, scratch_operands = 1 : i64, tpu.core_type = #tpu.core_type<tc>, window_params = [{transform_indices = @transform_0, window_bounds = array<i64: 8, 128>}, {pipeline_mode = #tpu.pipeline_mode<synchronous>, transform_indices = @transform_1, window_bounds = array<i64: 128, 128>}, {pipeline_mode = #tpu.pipeline_mode<synchronous>, transform_indices = @transform_2, window_bounds = array<i64: 1, 128>}, {pipeline_mode = #tpu.pipeline_mode<synchronous>, transform_indices = @transform_3, window_bounds = array<i64: 1, 128>}, {pipeline_mode = #tpu.pipeline_mode<synchronous>, transform_indices = @transform_4, window_bounds = array<i64: 1, 128>}, {transform_indices = @transform_5, window_bounds = array<i64: 128, 256>}, {transform_indices = @transform_6, window_bounds = array<i64: 1, 256>}, {transform_indices = @transform_7, window_bounds = array<i64: 8, 256>}]} {
    %c0_i32 = arith.constant 0 : i32
    %0 = arith.cmpi eq, %arg1, %c0_i32 : i32
    %1 = arith.extui %0 : i1 to i32
    %c0_i32_0 = arith.constant 0 : i32
    %2 = arith.cmpi ne, %1, %c0_i32_0 : i32
    scf.if %2 {
      %c0_8 = arith.constant 0 : index
      %c0_9 = arith.constant 0 : index
      %10 = vector.load %arg2[%c0_8, %c0_9] : memref<8x128xf32, #tpu.memory_space<vmem>>, vector<8x128xf32>
      %c0_10 = arith.constant 0 : index
      %c0_11 = arith.constant 0 : index
      %11 = vector.load %arg3[%c0_10, %c0_11] : memref<128x128xf32, #tpu.memory_space<vmem>>, vector<128x128xf32>
      %cst_12 = arith.constant dense<0.000000e+00> : vector<8x128xf32>
      %12 = tpu.matmul %10, %11, %cst_12 {dimension_numbers = #tpu.dot_dimension_numbers<[1], [0], [0], [1], [0, 0, 1, 1], [], []>} : vector<8x128xf32>, vector<128x128xf32>, vector<8x128xf32> -> vector<8x128xf32>
      %c0_13 = arith.constant 0 : index
      %c0_14 = arith.constant 0 : index
      %13 = vector.load %arg4[%c0_13, %c0_14] : memref<1x128xf32, #tpu.memory_space<vmem>>, vector<1x128xf32>
      %14 = vector.broadcast %13 : vector<1x128xf32> to vector<8x128xf32>
      %15 = arith.addf %12, %14 : vector<8x128xf32>
      %cst_15 = arith.constant 5.000000e-01 : f32
      %16 = vector.broadcast %cst_15 : f32 to vector<8x128xf32>
      %17 = arith.mulf %16, %15 : vector<8x128xf32>
      %cst_16 = arith.constant 0.707106769 : f32
      %18 = vector.broadcast %cst_16 : f32 to vector<8x128xf32>
      %19 = arith.mulf %15, %18 : vector<8x128xf32>
      %20 = math.erf %19 : vector<8x128xf32>
      %cst_17 = arith.constant 1.000000e+00 : f32
      %21 = vector.broadcast %cst_17 : f32 to vector<8x128xf32>
      %22 = arith.addf %21, %20 : vector<8x128xf32>
      %23 = arith.mulf %17, %22 : vector<8x128xf32>
      %cst_18 = arith.constant dense<0.000000e+00> : vector<8xf32>
      %24 = vector.multi_reduction <add>, %23, %cst_18 [1] : vector<8x128xf32> to vector<8xf32>
      %25 = vector.shape_cast %24 : vector<8xf32> to vector<8x1xf32>
      %cst_19 = arith.constant 1.280000e+02 : f32
      %26 = vector.broadcast %cst_19 : f32 to vector<8x1xf32>
      %27 = arith.divf %25, %26 : vector<8x1xf32>
      %28 = vector.broadcast %27 : vector<8x1xf32> to vector<8x128xf32>
      %29 = arith.subf %23, %28 : vector<8x128xf32>
      %30 = arith.mulf %29, %29 : vector<8x128xf32>
      %cst_20 = arith.constant dense<0.000000e+00> : vector<8xf32>
      %31 = vector.multi_reduction <add>, %30, %cst_20 [1] : vector<8x128xf32> to vector<8xf32>
      %32 = vector.shape_cast %31 : vector<8xf32> to vector<8x1xf32>
      %cst_21 = arith.constant 1.280000e+02 : f32
      %33 = vector.broadcast %cst_21 : f32 to vector<8x1xf32>
      %34 = arith.divf %32, %33 : vector<8x1xf32>
      %cst_22 = arith.constant 9.99999974E-6 : f32
      %35 = vector.broadcast %cst_22 : f32 to vector<8x1xf32>
      %36 = arith.addf %34, %35 : vector<8x1xf32>
      %37 = math.rsqrt %36 : vector<8x1xf32>
      %38 = vector.broadcast %37 : vector<8x1xf32> to vector<8x128xf32>
      %39 = arith.mulf %29, %38 : vector<8x128xf32>
      %c0_23 = arith.constant 0 : index
      %c0_24 = arith.constant 0 : index
      %40 = vector.load %arg5[%c0_23, %c0_24] : memref<1x128xf32, #tpu.memory_space<vmem>>, vector<1x128xf32>
      %41 = vector.broadcast %40 : vector<1x128xf32> to vector<8x128xf32>
      %42 = arith.mulf %39, %41 : vector<8x128xf32>
      %c0_25 = arith.constant 0 : index
      %c0_26 = arith.constant 0 : index
      %43 = vector.load %arg6[%c0_25, %c0_26] : memref<1x128xf32, #tpu.memory_space<vmem>>, vector<1x128xf32>
      %44 = vector.broadcast %43 : vector<1x128xf32> to vector<8x128xf32>
      %45 = arith.addf %42, %44 : vector<8x128xf32>
      %c0_27 = arith.constant 0 : index
      %c0_28 = arith.constant 0 : index
      %46 = vector.load %arg10[%c0_27, %c0_28] : memref<8x128xf32, #tpu.memory_space<vmem>>, vector<8x128xf32>
      tpu.vector_store %arg10[%c0_27, %c0_28], %45 {strides = array<i32>} : memref<8x128xf32, #tpu.memory_space<vmem>>, vector<8x128xf32>,
    } else {
    }
    %c0 = arith.constant 0 : index
    %c0_1 = arith.constant 0 : index
    %3 = vector.load %arg10[%c0, %c0_1] : memref<8x128xf32, #tpu.memory_space<vmem>>, vector<8x128xf32>
    %c0_2 = arith.constant 0 : index
    %c0_3 = arith.constant 0 : index
    %4 = vector.load %arg7[%c0_2, %c0_3] : memref<128x256xf32, #tpu.memory_space<vmem>>, vector<128x256xf32>
    %cst = arith.constant dense<0.000000e+00> : vector<8x256xf32>
    %5 = tpu.matmul %3, %4, %cst {dimension_numbers = #tpu.dot_dimension_numbers<[1], [0], [0], [1], [0, 0, 1, 1], [], []>} : vector<8x128xf32>, vector<128x256xf32>, vector<8x256xf32> -> vector<8x256xf32>
    %c0_4 = arith.constant 0 : index
    %c0_5 = arith.constant 0 : index
    %6 = vector.load %arg8[%c0_4, %c0_5] : memref<1x256xf32, #tpu.memory_space<vmem>>, vector<1x256xf32>
    %7 = vector.broadcast %6 : vector<1x256xf32> to vector<8x256xf32>
    %8 = arith.addf %5, %7 : vector<8x256xf32>
    %c0_6 = arith.constant 0 : index
    %c0_7 = arith.constant 0 : index
    %9 = vector.load %arg9[%c0_6, %c0_7] : memref<8x256xf32, #tpu.memory_space<vmem>>, vector<8x256xf32>
    tpu.vector_store %arg9[%c0_6, %c0_7], %8 {strides = array<i32>} : memref<8x256xf32, #tpu.memory_space<vmem>>, vector<8x256xf32>,
    return
  }
  func.func @transform_0(%arg0: i32, %arg1: i32) -> (i32, i32) {
    %c0_i32 = arith.constant 0 : i32
    %c0_i32_0 = arith.constant 0 : i32
    return %arg0, %c0_i32 : i32, i32
  }
  func.func @transform_1(%arg0: i32, %arg1: i32) -> (i32, i32) {
    %c0_i32 = arith.constant 0 : i32
    %c0_i32_0 = arith.constant 0 : i32
    %c0_i32_1 = arith.constant 0 : i32
    return %c0_i32, %c0_i32_0 : i32, i32
  }
  func.func @transform_2(%arg0: i32, %arg1: i32) -> (i32, i32) {
    %c0_i32 = arith.constant 0 : i32
    %c0_i32_0 = arith.constant 0 : i32
    %c0_i32_1 = arith.constant 0 : i32
    return %c0_i32, %c0_i32_0 : i32, i32
  }
  func.func @transform_3(%arg0: i32, %arg1: i32) -> (i32, i32) {
    %c0_i32 = arith.constant 0 : i32
    %c0_i32_0 = arith.constant 0 : i32
    %c0_i32_1 = arith.constant 0 : i32
    return %c0_i32, %c0_i32_0 : i32, i32
  }
  func.func @transform_4(%arg0: i32, %arg1: i32) -> (i32, i32) {
    %c0_i32 = arith.constant 0 : i32
    %c0_i32_0 = arith.constant 0 : i32
    %c0_i32_1 = arith.constant 0 : i32
    return %c0_i32, %c0_i32_0 : i32, i32
  }
  func.func @transform_5(%arg0: i32, %arg1: i32) -> (i32, i32) {
    %c0_i32 = arith.constant 0 : i32
    %c0_i32_0 = arith.constant 0 : i32
    return %c0_i32, %arg1 : i32, i32
  }
  func.func @transform_6(%arg0: i32, %arg1: i32) -> (i32, i32) {
    %c0_i32 = arith.constant 0 : i32
    %c0_i32_0 = arith.constant 0 : i32
    return %c0_i32, %arg1 : i32, i32
  }
  func.func @transform_7(%arg0: i32, %arg1: i32) -> (i32, i32) {
    %c0_i32 = arith.constant 0 : i32
    return %arg0, %arg1 : i32, i32
  }
}

module attributes {stable_mosaic.version = 11 : i64} {
  func.func @bert_mlm_kernel(%arg0: i32, %arg1: i32, %arg2: memref<8x128xf32, #tpu.memory_space<vmem>>, %arg3: memref<128x128xf32, #tpu.memory_space<vmem>>, %arg4: memref<1x128xf32, #tpu.memory_space<vmem>>, %arg5: memref<1x128xf32, #tpu.memory_space<vmem>>, %arg6: memref<1x128xf32, #tpu.memory_space<vmem>>, %arg7: memref<128x256xf32, #tpu.memory_space<vmem>>, %arg8: memref<1x256xf32, #tpu.memory_space<vmem>>, %arg9: memref<8x256xf32, #tpu.memory_space<vmem>>, %arg10: memref<8x128xf32, #tpu.memory_space<vmem>>) attributes {dimension_semantics = [#tpu.dimension_semantics<parallel>, #tpu.dimension_semantics<arbitrary>], iteration_bounds = array<i64: 2, 1>, scalar_prefetch = 0 : i64, scratch_operands = 1 : i64, tpu.core_type = #tpu.core_type<tc>, window_params = [{transform_indices = @transform_0, window_bounds = array<i64: 8, 128>}, {pipeline_mode = #tpu.pipeline_mode<synchronous>, transform_indices = @transform_1, window_bounds = array<i64: 128, 128>}, {pipeline_mode = #tpu.pipeline_mode<synchronous>, transform_indices = @transform_2, window_bounds = array<i64: 1, 128>}, {pipeline_mode = #tpu.pipeline_mode<synchronous>, transform_indices = @transform_3, window_bounds = array<i64: 1, 128>}, {pipeline_mode = #tpu.pipeline_mode<synchronous>, transform_indices = @transform_4, window_bounds = array<i64: 1, 128>}, {transform_indices = @transform_5, window_bounds = array<i64: 128, 256>}, {transform_indices = @transform_6, window_bounds = array<i64: 1, 256>}, {transform_indices = @transform_7, window_bounds = array<i64: 8, 256>}]} {
    %c0_i32 = arith.constant 0 : i32
    %0 = arith.cmpi eq, %arg1, %c0_i32 : i32
    %1 = arith.extui %0 : i1 to i32
    %c0_i32_0 = arith.constant 0 : i32
    %2 = arith.cmpi ne, %1, %c0_i32_0 : i32
    scf.if %2 {
      %c0_8 = arith.constant 0 : index
      %c0_9 = arith.constant 0 : index
      %10 = vector.load %arg2[%c0_8, %c0_9] : memref<8x128xf32, #tpu.memory_space<vmem>>, vector<8x128xf32>
      %c0_10 = arith.constant 0 : index
      %c0_11 = arith.constant 0 : index
      %11 = vector.load %arg3[%c0_10, %c0_11] : memref<128x128xf32, #tpu.memory_space<vmem>>, vector<128x128xf32>
      %cst_12 = arith.constant dense<0.000000e+00> : vector<8x128xf32>
      %12 = tpu.matmul %10, %11, %cst_12 {dimension_numbers = #tpu.dot_dimension_numbers<[1], [0], [0], [1], [0, 0, 1, 1], [], []>} : vector<8x128xf32>, vector<128x128xf32>, vector<8x128xf32> -> vector<8x128xf32>
      %c0_13 = arith.constant 0 : index
      %c0_14 = arith.constant 0 : index
      %13 = vector.load %arg4[%c0_13, %c0_14] : memref<1x128xf32, #tpu.memory_space<vmem>>, vector<1x128xf32>
      %14 = vector.broadcast %13 : vector<1x128xf32> to vector<8x128xf32>
      %15 = arith.addf %12, %14 : vector<8x128xf32>
      %cst_15 = arith.constant 5.000000e-01 : f32
      %16 = vector.broadcast %cst_15 : f32 to vector<8x128xf32>
      %17 = arith.mulf %16, %15 : vector<8x128xf32>
      %cst_16 = arith.constant 0.707106769 : f32
      %18 = vector.broadcast %cst_16 : f32 to vector<8x128xf32>
      %19 = arith.mulf %15, %18 : vector<8x128xf32>
      %20 = math.erf %19 : vector<8x128xf32>
      %cst_17 = arith.constant 1.000000e+00 : f32
      %21 = vector.broadcast %cst_17 : f32 to vector<8x128xf32>
      %22 = arith.addf %21, %20 : vector<8x128xf32>
      %23 = arith.mulf %17, %22 : vector<8x128xf32>
      %cst_18 = arith.constant dense<0.000000e+00> : vector<8xf32>
      %24 = vector.multi_reduction <add>, %23, %cst_18 [1] : vector<8x128xf32> to vector<8xf32>
      %25 = vector.shape_cast %24 : vector<8xf32> to vector<8x1xf32>
      %cst_19 = arith.constant 1.280000e+02 : f32
      %26 = vector.broadcast %cst_19 : f32 to vector<8x1xf32>
      %27 = arith.divf %25, %26 : vector<8x1xf32>
      %28 = vector.broadcast %27 : vector<8x1xf32> to vector<8x128xf32>
      %29 = arith.subf %23, %28 : vector<8x128xf32>
      %30 = arith.mulf %29, %29 : vector<8x128xf32>
      %cst_20 = arith.constant dense<0.000000e+00> : vector<8xf32>
      %31 = vector.multi_reduction <add>, %30, %cst_20 [1] : vector<8x128xf32> to vector<8xf32>
      %32 = vector.shape_cast %31 : vector<8xf32> to vector<8x1xf32>
      %cst_21 = arith.constant 1.280000e+02 : f32
      %33 = vector.broadcast %cst_21 : f32 to vector<8x1xf32>
      %34 = arith.divf %32, %33 : vector<8x1xf32>
      %cst_22 = arith.constant 9.99999974E-6 : f32
      %35 = vector.broadcast %cst_22 : f32 to vector<8x1xf32>
      %36 = arith.addf %34, %35 : vector<8x1xf32>
      %37 = math.rsqrt %36 : vector<8x1xf32>
      %38 = vector.broadcast %37 : vector<8x1xf32> to vector<8x128xf32>
      %39 = arith.mulf %29, %38 : vector<8x128xf32>
      %c0_23 = arith.constant 0 : index
      %c0_24 = arith.constant 0 : index
      %40 = vector.load %arg5[%c0_23, %c0_24] : memref<1x128xf32, #tpu.memory_space<vmem>>, vector<1x128xf32>
      %41 = vector.broadcast %40 : vector<1x128xf32> to vector<8x128xf32>
      %42 = arith.mulf %39, %41 : vector<8x128xf32>
      %c0_25 = arith.constant 0 : index
      %c0_26 = arith.constant 0 : index
      %43 = vector.load %arg6[%c0_25, %c0_26] : memref<1x128xf32, #tpu.memory_space<vmem>>, vector<1x128xf32>
      %44 = vector.broadcast %43 : vector<1x128xf32> to vector<8x128xf32>
      %45 = arith.addf %42, %44 : vector<8x128xf32>
      %c0_27 = arith.constant 0 : index
      %c0_28 = arith.constant 0 : index
      %46 = vector.load %arg10[%c0_27, %c0_28] : memref<8x128xf32, #tpu.memory_space<vmem>>, vector<8x128xf32>
      tpu.vector_store %arg10[%c0_27, %c0_28], %45 {strides = array<i32>} : memref<8x128xf32, #tpu.memory_space<vmem>>, vector<8x128xf32>,
    } else {
    }
    %c0 = arith.constant 0 : index
    %c0_1 = arith.constant 0 : index
    %3 = vector.load %arg10[%c0, %c0_1] : memref<8x128xf32, #tpu.memory_space<vmem>>, vector<8x128xf32>
    %c0_2 = arith.constant 0 : index
    %c0_3 = arith.constant 0 : index
    %4 = vector.load %arg7[%c0_2, %c0_3] : memref<128x256xf32, #tpu.memory_space<vmem>>, vector<128x256xf32>
    %cst = arith.constant dense<0.000000e+00> : vector<8x256xf32>
    %5 = tpu.matmul %3, %4, %cst {dimension_numbers = #tpu.dot_dimension_numbers<[1], [0], [0], [1], [0, 0, 1, 1], [], []>} : vector<8x128xf32>, vector<128x256xf32>, vector<8x256xf32> -> vector<8x256xf32>
    %c0_4 = arith.constant 0 : index
    %c0_5 = arith.constant 0 : index
    %6 = vector.load %arg8[%c0_4, %c0_5] : memref<1x256xf32, #tpu.memory_space<vmem>>, vector<1x256xf32>
    %7 = vector.broadcast %6 : vector<1x256xf32> to vector<8x256xf32>
    %8 = arith.addf %5, %7 : vector<8x256xf32>
    %c0_6 = arith.constant 0 : index
    %c0_7 = arith.constant 0 : index
    %9 = vector.load %arg9[%c0_6, %c0_7] : memref<8x256xf32, #tpu.memory_space<vmem>>, vector<8x256xf32>
    tpu.vector_store %arg9[%c0_6, %c0_7], %8 {strides = array<i32>} : memref<8x256xf32, #tpu.memory_space<vmem>>, vector<8x256xf32>,
    return
  }
  func.func @transform_0(%arg0: i32, %arg1: i32) -> (i32, i32) {
    %c0_i32 = arith.constant 0 : i32
    %c0_i32_0 = arith.constant 0 : i32
    return %arg0, %c0_i32 : i32, i32
  }
  func.func @transform_1(%arg0: i32, %arg1: i32) -> (i32, i32) {
    %c0_i32 = arith.constant 0 : i32
    %c0_i32_0 = arith.constant 0 : i32
    %c0_i32_1 = arith.constant 0 : i32
    return %c0_i32, %c0_i32_0 : i32, i32
  }
  func.func @transform_2(%arg0: i32, %arg1: i32) -> (i32, i32) {
    %c0_i32 = arith.constant 0 : i32
    %c0_i32_0 = arith.constant 0 : i32
    %c0_i32_1 = arith.constant 0 : i32
    return %c0_i32, %c0_i32_0 : i32, i32
  }
  func.func @transform_3(%arg0: i32, %arg1: i32) -> (i32, i32) {
    %c0_i32 = arith.constant 0 : i32
    %c0_i32_0 = arith.constant 0 : i32
    %c0_i32_1 = arith.constant 0 : i32
    return %c0_i32, %c0_i32_0 : i32, i32
  }
  func.func @transform_4(%arg0: i32, %arg1: i32) -> (i32, i32) {
    %c0_i32 = arith.constant 0 : i32
    %c0_i32_0 = arith.constant 0 : i32
    %c0_i32_1 = arith.constant 0 : i32
    return %c0_i32, %c0_i32_0 : i32, i32
  }
  func.func @transform_5(%arg0: i32, %arg1: i32) -> (i32, i32) {
    %c0_i32 = arith.constant 0 : i32
    %c0_i32_0 = arith.constant 0 : i32
    return %c0_i32, %arg1 : i32, i32
  }
  func.func @transform_6(%arg0: i32, %arg1: i32) -> (i32, i32) {
    %c0_i32 = arith.constant 0 : i32
    %c0_i32_0 = arith.constant 0 : i32
    return %c0_i32, %arg1 : i32, i32
  }
  func.func @transform_7(%arg0: i32, %arg1: i32) -> (i32, i32) {
    %c0_i32 = arith.constant 0 : i32
    return %arg0, %arg1 : i32, i32
  }
}

</mosaic_0001>

<bundles_post_ra>
// kernel: tpu_custom_call.1
= control target key start
LH: loop header
LB: loop body
LE: loop exit
PB: predicated region body
PF: predicated region fallthrough
CT: control target
= control target key end

     0   :  { %12 = vsyncpa [#allocation4], 0  ;;  %s1463_s0 = inlined_call_operand.hbm [shape: f32[16,128], index: 0, kind: input, shape index: {}]   ;;  %s1464_s1 = inlined_call_operand.hbm [shape: f32[128,128], index: 1, kind: input, shape index: {}]   ;;  %s1465_s2 = inlined_call_operand.vmem [shape: f32[1,128], index: 2, kind: input, shape index: {}]   ;;  %s1466_s3 = inlined_call_operand.vmem [shape: f32[1,128], index: 3, kind: input, shape index: {}]   ;;  %s1467_s4 = inlined_call_operand.vmem [shape: f32[1,128], index: 4, kind: input, shape index: {}]   ;;  %s1468_s5 = inlined_call_operand.hbm [shape: f32[128,256], index: 5, kind: input, shape index: {}]   ;;  %s1469_s6 = inlined_call_operand.vmem [shape: f32[1,256], index: 6, kind: input, shape index: {}]   ;;  %s1470_s7 = inlined_call_operand.hbm [shape: f32[16,256], index: 7, kind: output, shape index: {}]  }
   0x1   :  { %14 = vsyncpa [#allocation4 + $0x1], 0 }
   0x2   :  { %15 = vsyncpa [#allocation7], 0 }
   0x3   :  { %16 = vsyncpa [#allocation5], 0 }
   0x4   :  { %18 = vsyncpa [#allocation5 + $0x1], 0  ;;  %s1197_s24 = smov 0   ;;  %s1199_s25 = smov 0  }
   0x5   :  { %s1201_s26 = smov 0   ;;  %s1203_s27 = smov 0  }
   0x6   :  { %s1205_s28 = smov 0   ;;  %s1207_s29 = smov 0  }
   0x7 LB: > { %1477 = sst [smem:[#allocation13_spill]] %s1124_s24  ;;  %s747_s30 = sadd.s32 4294967295, %s1144_s29   ;;  %s1144_s29 = sphi %s1207_s29, %s24_s29   ;;  %s1140_s28 = sphi %s1205_s28, %s1498_s28   ;;  %s1136_s27 = sphi %s1203_s27, %s1497_s27   ;;  %s1132_s26 = sphi %s1201_s26, %s1496_s26   ;;  %s1128_s25 = sphi %s1199_s25, %s1495_s25   ;;  %s1124_s24 = sphi %s1197_s24, %s1494_s24  }
   0x8   : > { %s748_s8 = sadd.s32 4294967294, %s1144_s29   ;;  %p56_p0 = scmp.ne.s32.totalorder %s1128_s25, %s1124_s24 }
   0x9   : > { %p1231_p1 = scmp.eq.s32.totalorder %s747_s30, 0  ;;  %p1235_p2 = scmp.eq.s32.totalorder %s747_s30, 1 }
   0xa   : > { %p224_p3 = scmp.eq.s32.totalorder %s748_s8, 1  ;;  %p749_p5 = scmp.ge.s32.totalorder %s1144_s29, 1 }
   0xb   : > { %s1478_s9 = scalar_select %p1231_p1, 1, 0 }
   0xc   : > { %p1241_p4 = por %p1231_p1, %p56_p0  ;;  %p1246_p6 = por %p224_p3, %p56_p0 }
   0xd   : > { %p231_p7 = scmp.lt.s32.totalorder %s1144_s29, 3  ;;  %s1146_s14 = smov [#allocation6]  }
   0xe   : > { %s1480_s11 = scalar_select %p1241_p4, 1, 0 }
   0xf   : > { %s1481_s12 = scalar_select %p1246_p6, 1, 0 }
  0x10   : > { %p1251_p8 = pnand %p749_p5, %p231_p7  ;;  %s243_s15 = sshll.u32 %s1146_s14, 4  ;;  %s1255_s15 = int_to_ptr.vmem [resolvable:$true] %s243_s15 }
  0x11   : > { %1482 = sst [smem:[#allocation14_spill]] %s1481_s12  ;;  %s1147_s17 = smov [#allocation8]  }
  0x12   : > { %p890_p9 = pneg %p1251_p8  ;;  %s268_s18 = sshll.u32 %s1147_s17, 4  ;;  %s1266_s18 = int_to_ptr.vmem [resolvable:$true] %s268_s18 }
  0x13   : > { %s972_s21 = scalar_lea.hbm %s1464_s1, 2048 }
  0x14   : > { %p1262_p11 = pnand %p890_p9, %p1231_p1  ;;  %p973_p12 = scmp.ne.s32.totalorder %s1464_s1, %s972_s21 }
  0x15   : > { %p979_p5 = scmp.lt.u32.totalorder %s972_s21, %s1464_s1 }
  0x16   : > { %p974_p13 = pneg %p1262_p11 }
  0x18   : > { %p975_p0 = pnand %p974_p13, %p973_p12 }
  0x1a   : > { %p976_p3 = pneg %p975_p0 }
  0x1c   : > { %p981_p7 = pnand %p979_p5, %p976_p3 }
  0x1e   : > { %984 = shalt.err (!%p981_p7)
}
  0x1f   : > { %s985_s14 = scalar_lea.vmem %s1255_s15, 2048  ;;  %p993_p1 = scmp.lt.s32.totalorder %s1255_s15, %s1255_s15 }
  0x20   : > { %p986_p9 = scmp.ne.s32.totalorder %s1255_s15, %s985_s14  ;;  %p994_p12 = scmp.lt.s32.totalorder %s985_s14, %s985_s14 }
  0x22   : > { %p988_p10 = pnand %p986_p9, %p974_p13  ;;  %p995_p0 = por %p994_p12, %p993_p1 }
  0x24   : > { %p989_p6 = pneg %p988_p10 }
  0x26   : > { %p996_p4 = pnand %p995_p0, %p989_p6 }
  0x28   : > { %999 = shalt.err (!%p996_p4)
}
  0x29   : > { %s1148_s17 = smov 128   ;;  %s1149_s19 = smov 8  }
  0x2a   : > { %893 = dma.hbm_to_vmem [thread:$0]  (!%p1262_p11), %s1464_s1, 2048, %s1255_s15, [#allocation7], %s1148_s17, %s1148_s17, %s1149_s19  }
  0x2b   : > { %s1000_s30 = scalar_lea.hbm %s1468_s5, 4096 }
  0x2c   : > { %p1001_p1 = scmp.ne.s32.totalorder %s1468_s5, %s1000_s30  ;;  %p1007_p10 = scmp.lt.u32.totalorder %s1000_s30, %s1468_s5 }
  0x2e   : > { %p1003_p4 = pnand %p1001_p1, %p974_p13 }
  0x30   : > { %p1004_p6 = pneg %p1003_p4 }
  0x32   : > { %p1009_p3 = pnand %p1007_p10, %p1004_p6 }
  0x34   : > { %1012 = shalt.err (!%p1009_p3)
}
  0x35   : > { %s1013_s15 = scalar_lea.vmem %s1266_s18, 4096  ;;  %p1021_p12 = scmp.lt.s32.totalorder %s1266_s18, %s1266_s18 }
  0x36   : > { %p1014_p5 = scmp.ne.s32.totalorder %s1266_s18, %s1013_s15  ;;  %p1022_p0 = scmp.lt.s32.totalorder %s1013_s15, %s1013_s15 }
  0x38   : > { %p1016_p7 = pnand %p1014_p5, %p974_p13  ;;  %p1023_p1 = por %p1022_p0, %p1021_p12 }
  0x3a   : > { %p1017_p9 = pneg %p1016_p7 }
  0x3c   : > { %p1024_p4 = pnand %p1023_p1, %p1017_p9 }
  0x3e   : > { %1027 = shalt.err (!%p1024_p4)
}
  0x3f   : > { %s1150_s24 = smov 256   ;;  %s1151_s12 = smov 16  }
  0x40   : > { %896 = dma.hbm_to_vmem [thread:$0]  (!%p1262_p11), %s1468_s5, 4096, %s1266_s18, [#allocation7], %s1150_s24, %s1150_s24, %s1151_s12  }
  0x41   : > { %s36_s20 = sadd.s32 1, %s1140_s28  ;;  %s43_s21 = sadd.s32 1, %s1132_s26 }
  0x42   : > { %p38_p13 = scmp.ge.s32.totalorder %s36_s20, 2  ;;  %p50_p6 = scmp.ne.s32.totalorder %s1132_s26, %s1128_s25 }
  0x43   : > { %p51_p10 = scmp.eq.s32.totalorder %s1144_s29, 0  ;;  %p907_p3 = scmp.lt.s32.totalorder %s1144_s29, 2 }
  0x44   : > { %s1500_s20 = smov (%p38_p13, %s36_s20), 0  ;;  %p1330_p7 = por %p1235_p2, %p50_p6 }
  0x45   : > { %p52_p5 = por %p51_p10, %p50_p6  ;;  %s40_s16 = ssub.s32 %s1140_s28, %s1500_s20 }
  0x46   : > { %s1485_s22 = scalar_select %p1330_p7, 1, 0 }
  0x47   : > { %s290_s23 = sand.u32 1, %s1132_s26   ;;  %p41_p9 = scmp.eq.s32.totalorder %s40_s16, 0 }
  0x48   : > { %s754_s18 = sshll.u32 %s290_s23, 3  ;;  %s755_s30 = sshll.u32 %s1140_s28, 7 }
  0x49   : > { %s1339_s8 = scalar_select %p41_p9, %s1132_s26, %s43_s21  }
  0x4a   : > { %s1344_s24 = scalar_lea.hbm %s1463_s0, %s755_s30  ;;  %s294_s10 = scalar_lea.vmem [#allocation3], %s754_s18 }
  0x4b   : > { %s301_s12 = sshll.u32 %s294_s10, 4  ;;  %p1348_p2 = pnand %p907_p3, %p52_p5  ;;  %s1352_s12 = int_to_ptr.vmem [resolvable:$true] %s301_s12 }
  0x4c   : > { %s291_s19 = scalar_lea.sflag [#allocation4], %s290_s23  ;;  %s1028_s21 = scalar_lea.hbm %s1344_s24, 128 }
  0x4d   : > { %p1029_p11 = scmp.ne.s32.totalorder %s1344_s24, %s1028_s21  ;;  %p1030_p12 = pneg %p1348_p2 }
  0x4e   : > { %s1033_s30 = scalar_lea.hbm %s1463_s0, 256  ;;  %p1034_p4 = scmp.lt.u32.totalorder %s1344_s24, %s1463_s0 }
  0x4f   : > { %p1031_p0 = pnand %p1030_p12, %p1029_p11  ;;  %p1035_p13 = scmp.lt.u32.totalorder %s1033_s30, %s1028_s21 }
  0x50   : > { %p1037_p10 = scmp.lt.u32.totalorder %s1028_s21, %s1344_s24 }
  0x51   : > { %p1032_p1 = pneg %p1031_p0  ;;  %p1036_p6 = por %p1035_p13, %p1034_p4 }
  0x53   : > { %p1038_p3 = por %p1037_p10, %p1036_p6 }
  0x55   : > { %p1039_p5 = pnand %p1038_p3, %p1032_p1 }
  0x57   : > { %1042 = shalt.err (!%p1039_p5)
}
  0x58   : > { %s1043_s23 = scalar_lea.vmem %s1352_s12, 128  ;;  %s1152_s10 = smov [#allocation3]  }
  0x59   : > { %p1044_p9 = scmp.ne.s32.totalorder %s1352_s12, %s1043_s23  ;;  %s1048_s16 = sshll.u32 %s1152_s10, 4  ;;  %s1049_s16 = int_to_ptr.vmem [resolvable:$false] %s1048_s16 }
  0x5a   : > { %s1050_s18 = scalar_lea.vmem %s1049_s16, 256  ;;  %p1051_p7 = scmp.lt.s32.totalorder %s1352_s12, %s1049_s16 }
  0x5b   : > { %p1046_p11 = pnand %p1044_p9, %p1030_p12  ;;  %p1052_p4 = scmp.lt.s32.totalorder %s1050_s18, %s1043_s23 }
  0x5d   : > { %p1047_p0 = pneg %p1046_p11  ;;  %p1053_p13 = por %p1052_p4, %p1051_p7 }
  0x5f   : > { %p1054_p6 = pnand %p1053_p13, %p1047_p0 }
  0x61   : > { %1057 = shalt.err (!%p1054_p6)
}
  0x62   : > { %900 = dma.hbm_to_vmem [thread:$0]  (!%p1348_p2), %s1344_s24, 128, %s1352_s12, %s291_s19  }
  0x63   : > { %310 = sbr.rel (%p1251_p8) target bundleno = 916 (0x394), region = 48  ;;  %s1382_s21 = sand.u32 (!%p1251_p8), 1, %s1128_s25  }
  0x64   : > { %s757_s30 = sshll.u32 (!%p1251_p8), %s1382_s21, 3  ;;  %s313_s14 = scalar_lea.sflag (!%p1251_p8), [#allocation4], %s1382_s21 }
  0x65   : > { %s1386_s15 = scalar_lea.vmem (!%p1251_p8), [#allocation3], %s757_s30  ;;  %p1487_p7 = scmp.ne.s32.totalorder (!%p1251_p8), %s1480_s11, 0 }
  0x6a   : > { %1111 = dma.done.wait (%p1487_p7), %s313_s14, 128  }
  0x6b   : > { %1113 = vsyncadd (%p1487_p7), %s313_s14, 4294967168  ;;  %p1488_p2 = scmp.ne.s32.totalorder %s1478_s9, 0 }
  0x6d   : > { %1115 = dma.done.wait (%p1488_p2), [#allocation7], 6144  }
  0x6e   : > { %1117 = vsyncadd (%p1488_p2), [#allocation7], 4294961152  ;;  %v1153_v0 = vmov 0.0|0.0   ;;  %vm1154_vm0 = vmmov 0   ;;  %v1155_v1 = vmov 0.0   ;;  %v371_v2 = vld [vmem:[#allocation6] sm:$0xff] }
  0x6f   : > { %822 = vmatprep.subr.bf16.mxu0 %v1153_v0  ;;  %819 = vmatprep.mubr.msk.f32.mxu0 %vm1154_vm0, %v1155_v1  ;;  %v372_v3 = vld [vmem:[#allocation6 + $0x8] sm:$0xff]  ;;  %v373_v4 = vld [vmem:[#allocation6 + $0x10] sm:$0xff]  ;;  %v374_v6 = vld [vmem:[#allocation6 + $0x18] sm:$0xff]  ;;  %s760_s19 = sshll.u32 %s1382_s21, 4  ;;  %s769_s16 = sshll.u32 %s1136_s27, 8 }
  0x70   : > { %607 = vmatprep.mubr.f32.mxu1 %v1155_v1  ;;  %v823_v5 = vpack.c.bf16 %v372_v3, %v371_v2  ;;  %v826_v7 = vpack.c.bf16 %v374_v6, %v373_v4  ;;  %v375_v8 = vld [vmem:[#allocation6 + $0x20] sm:$0xff]  ;;  %v376_v9 = vld [vmem:[#allocation6 + $0x28] sm:$0xff]  ;;  %v377_v11 = vld [vmem:[#allocation6 + $0x30] sm:$0xff]  ;;  %s358_s18 = scalar_lea.vmem [#allocation9], %s760_s19  ;;  %s1414_s9 = scalar_lea.hbm %s1470_s7, %s769_s16 }
  0x71   : > { %v829_v10 = vpack.c.bf16 %v376_v9, %v375_v8  ;;  %v378_v12 = vld [vmem:[#allocation6 + $0x38] sm:$0xff]  ;;  %v379_v14 = vld [vmem:[#allocation6 + $0x40] sm:$0xff]  ;;  %v380_v15 = vld [vmem:[#allocation6 + $0x48] sm:$0xff]  ;;  %s633_s30 = sshll.u32 %s358_s18, 4  ;;  %s617_s11 = scalar_lea.sflag [#allocation5], %s1382_s21  ;;  %s1416_s30 = int_to_ptr.vmem [resolvable:$true] %s633_s30 }
  0x72   : > { %824 = vmatpush3.bf16.msra.mxu0 %v823_v5  ;;  %v832_v13 = vpack.c.bf16 %v378_v12, %v377_v11  ;;  %v835_v16 = vpack.c.bf16 %v380_v15, %v379_v14  ;;  %v381_v17 = vld [vmem:[#allocation6 + $0x50] sm:$0xff]  ;;  %v382_v18 = vld [vmem:[#allocation6 + $0x58] sm:$0xff]  ;;  %v383_v20 = vld [vmem:[#allocation6 + $0x60] sm:$0xff]  ;;  %s1058_s27 = scalar_lea.vmem %s1416_s30, 256  ;;  %p1489_p12 = scmp.ne.s32.totalorder %s1485_s22, 0 }
  0x73   : > { %825 = vmatprep.subr.bf16.mxu0 %v1153_v0  ;;  %v838_v19 = vpack.c.bf16 %v382_v18, %v381_v17  ;;  %v384_v21 = vld [vmem:[#allocation6 + $0x68] sm:$0xff]  ;;  %v385_v23 = vld [vmem:[#allocation6 + $0x70] sm:$0xff]  ;;  %v386_v24 = vld [vmem:[#allocation6 + $0x78] sm:$0xff]  ;;  %p1059_p8 = scmp.ne.s32.totalorder %s1416_s30, %s1058_s27  ;;  %s1156_s13 = smov [#allocation9]  }
  0x74   : > { %v841_v22 = vpack.c.bf16 %v384_v21, %v383_v20  ;;  %v844_v25 = vpack.c.bf16 %v386_v24, %v385_v23  ;;  %v370_v26 = vld [vmem:[%s1386_s15] sm:$0xff]  ;;  %v500_v36 = vld [vmem:[#allocation8 + $0x8] sm:$0xff]  ;;  %v499_v38 = vld [vmem:[#allocation8] sm:$0xff]  ;;  %s1062_s24 = sshll.u32 %s1156_s13, 4  ;;  %s1063_s24 = int_to_ptr.vmem [resolvable:$false] %s1062_s24 }
  0x75   : > { %v761_v27 = vld [vmem:[%s1465_s2] ss:$0 sm:$0xff]  ;;  %v502_v37 = vld [vmem:[#allocation8 + $0x18] sm:$0xff]  ;;  %v504_v41 = vld [vmem:[#allocation8 + $0x28] sm:$0xff]  ;;  %p1060_p1 = pnand %p1059_p8, %p1489_p12  ;;  %s1064_s12 = scalar_lea.vmem %s1063_s24, 512 }
  0x76   : > { %827 = vmatpush3.bf16.msra.mxu0 %v826_v7  ;;  %v846_v39 = vpack.c.bf16 %v502_v37, %v500_v36  ;;  %v501_v40 = vld [vmem:[#allocation8 + $0x10] sm:$0xff]  ;;  %v506_v42 = vld [vmem:[#allocation8 + $0x38] sm:$0xff]  ;;  %v503_v45 = vld [vmem:[#allocation8 + $0x20] sm:$0xff]  ;;  %p1065_p3 = scmp.lt.s32.totalorder %s1416_s30, %s1063_s24  ;;  %p1066_p5 = scmp.lt.s32.totalorder %s1064_s12, %s1058_s27 }
  0x77   : > { %828 = vmatprep.subr.bf16.mxu0 %v1153_v0  ;;  %v848_v43 = vpack.c.bf16 %v501_v40, %v499_v38  ;;  %v850_v44 = vpack.c.bf16 %v506_v42, %v504_v41  ;;  %v505_v46 = vld [vmem:[#allocation8 + $0x30] sm:$0xff]  ;;  %v508_v47 = vld [vmem:[#allocation8 + $0x48] sm:$0xff]  ;;  %v510_v48 = vld [vmem:[#allocation8 + $0x58] sm:$0xff]  ;;  %p1061_p10 = pneg %p1060_p1 }
  0x78   : > { %847 = vmatprep.subr.bf16.mxu1 %v846_v39  ;;  %v852_v49 = vpack.c.bf16 %v505_v46, %v503_v45  ;;  %v854_v50 = vpack.c.bf16 %v510_v48, %v508_v47  ;;  %v507_v51 = vld [vmem:[#allocation8 + $0x40] sm:$0xff]  ;;  %v509_v52 = vld [vmem:[#allocation8 + $0x50] sm:$0xff]  ;;  %v512_v58 = vld [vmem:[#allocation8 + $0x68] sm:$0xff]  ;;  %p1067_p9 = por %p1066_p5, %p1065_p3 }
  0x79   : > { %849 = vmatpush1.bf16.msra.mxu1 %v848_v43  ;;  %v856_v53 = vpack.c.bf16 %v509_v52, %v507_v51  ;;  %v514_v59 = vld [vmem:[#allocation8 + $0x78] sm:$0xff]  ;;  %v511_v61 = vld [vmem:[#allocation8 + $0x60] sm:$0xff]  ;;  %v513_v62 = vld [vmem:[#allocation8 + $0x70] sm:$0xff] }
  0x7a   : > { %830 = vmatpush3.bf16.msra.mxu0 %v829_v10  ;;  %851 = vmatprep.subr.bf16.mxu1 %v850_v44  ;;  %v858_v60 = vpack.c.bf16 %v514_v59, %v512_v58  ;;  %v860_v63 = vpack.c.bf16 %v513_v62, %v511_v61  ;;  %v518_v1 = vld [vmem:[#allocation8 + $0x98] sm:$0xff]  ;;  %v515_v3 = vld [vmem:[#allocation8 + $0x80] sm:$0xff]  ;;  %v517_v4 = vld [vmem:[#allocation8 + $0x90] sm:$0xff]  ;;  %p1068_p11 = pnand %p1067_p9, %p1061_p10 }
  0x7b   : > { %831 = vmatprep.subr.bf16.mxu0 %v1153_v0  ;;  %v864_v5 = vpack.c.bf16 %v517_v4, %v515_v3  ;;  %v520_v6 = vld [vmem:[#allocation8 + $0xa8] sm:$0xff]  ;;  %v522_v7 = vld [vmem:[#allocation8 + $0xb8] sm:$0xff]  ;;  %v519_v8 = vld [vmem:[#allocation8 + $0xa0] sm:$0xff] }
  0x7c   : > { %v866_v9 = vpack.c.bf16 %v522_v7, %v520_v6  ;;  %v521_v10 = vld [vmem:[#allocation8 + $0xb0] sm:$0xff]  ;;  %v524_v11 = vld [vmem:[#allocation8 + $0xc8] sm:$0xff]  ;;  %v526_v12 = vld [vmem:[#allocation8 + $0xd8] sm:$0xff] }
  0x7d   : > { %853 = vmatpush1.bf16.msra.mxu1 %v852_v49  ;;  %v870_v14 = vpack.c.bf16 %v526_v12, %v524_v11  ;;  %v523_v15 = vld [vmem:[#allocation8 + $0xc0] sm:$0xff]  ;;  %v528_v17 = vld [vmem:[#allocation8 + $0xe8] sm:$0xff]  ;;  %v530_v18 = vld [vmem:[#allocation8 + $0xf8] sm:$0xff] }
  0x7e   : > { %833 = vmatpush3.bf16.msra.mxu0 %v832_v13  ;;  %855 = vmatprep.subr.bf16.mxu1 %v854_v50  ;;  %v868_v13 = vpack.c.bf16 %v521_v10, %v519_v8  ;;  %v874_v20 = vpack.c.bf16 %v530_v18, %v528_v17  ;;  %v527_v21 = vld [vmem:[#allocation8 + $0xe0] sm:$0xff]  ;;  %v531_v36 = vld [vmem:[%s1469_s6] sm:$0x3] }
  0x7f   : > { %834 = vmatprep.subr.bf16.mxu0 %v1153_v0 }
  0x81   : > { %857 = vmatpush1.bf16.msra.mxu1 %v856_v53 }
  0x82   : > { %836 = vmatpush3.bf16.msra.mxu0 %v835_v16  ;;  %859 = vmatprep.subr.bf16.mxu1 %v858_v60  ;;  %v525_v16 = vld [vmem:[#allocation8 + $0xd0] sm:$0xff] }
  0x83   : > { %837 = vmatprep.subr.bf16.mxu0 %v1153_v0 }
  0x85   : > { %861 = vmatpush1.bf16.msra.mxu1 %v860_v63 }
  0x86   : > { %839 = vmatpush3.bf16.msra.mxu0 %v838_v19  ;;  %v872_v19 = vpack.c.bf16 %v525_v16, %v523_v15 }
  0x87   : > { %840 = vmatprep.subr.bf16.mxu0 %v1153_v0 }
  0x8a   : > { %842 = vmatpush3.bf16.msra.mxu0 %v841_v22  ;;  %v529_v22 = vld [vmem:[#allocation8 + $0xf0] sm:$0xff] }
  0x8b   : > { %843 = vmatprep.subr.bf16.mxu0 %v1153_v0  ;;  %v516_v0 = vld [vmem:[#allocation8 + $0x88] sm:$0xff]  ;;  %v876_v23 = vpack.c.bf16 %v529_v22, %v527_v21 }
  0x8c   : > { %v862_v2 = vpack.c.bf16 %v518_v1, %v516_v0 }
  0x8e   : > { %845 = vmatpush3.bf16.msra.mxu0 %v844_v25  ;;  %863 = vmatprep.subr.bf16.mxu1 %v862_v2 }
  0x8f   : > { %865 = vmatpush1.bf16.msra.mxu1 %v864_v5 }
  0x90   : > { %867 = vmatprep.subr.bf16.mxu1 %v866_v9 }
  0x91   : > { %820 = vmatmul.mubr.f32.vlgmr.msra.gmra.mrb[0].mxu0 %v370_v26 }
  0x93   : > { %869 = vmatpush1.bf16.msra.mxu1 %v868_v13 }
  0x94   : > { %871 = vmatprep.subr.bf16.mxu1 %v870_v14 }
  0x97   : > { %873 = vmatpush1.bf16.msra.mxu1 %v872_v19 }
  0x98   : > { %875 = vmatprep.subr.bf16.mxu1 %v874_v20 }
  0x9b   : > { %877 = vmatpush1.bf16.msra.mxu1 %v876_v23 }
 0x164   : > { %v460_v28 = vpop.f32.mrb[0].mxu0 }
 0x165   : > { %v461_v29 = vadd.f32 %v761_v27, %v460_v28  ;;  %v821_v30 = vpop.f32.mrb[1].mxu0  ;;  %v762_v28 = vld [vmem:[%s1466_s3] ss:$0 sm:$0xff] }
 0x166   : > { %v763_v30 = vld [vmem:[%s1467_s4] ss:$0 sm:$0xff] }
 0x167   : > { %v465_v31 = vmul.f32 0.70710677, %v461_v29  ;;  %v464_v33 = vmul.f32 0.5, %v461_v29 }
 0x169   : > { %968 = verf.f32 %v465_v31 }
 0x173   : > { %v969_v32 = vpop.eup %968 }
 0x174   : > { %v467_v34 = vadd.f32 1.0, %v969_v32 }
 0x176   : > { %v468_v35 = vmul.f32 %v467_v34, %v464_v33  ;;  %v533_v33 = vlaneseq }
 0x178   : > { %469 = vadd.xlane.f32.xlu0 %v468_v35  ;;  %v534_v34 = vshrl.u32 %v533_v33, 7 }
 0x17a   : > { %v539_v37 = vsub.s32 1, %v534_v34 }
 0x17c   : > { %v540_v39 = vrot.slane %v531_v36, %v539_v37 }
 0x205   : > { %v470_v54 = vpop.xlane.xlu0 %469 }
 0x206   : > { %v472_v55 = vmul.f32 0.0078125, %v470_v54 }
 0x208   : > { %v473_v56 = vsub.f32 %v468_v35, %v472_v55  ;;  %v535_v35 = vsub.s32 0, %v534_v34 }
 0x20a   : > { %v474_v57 = vmul.f32 %v473_v56, %v473_v56  ;;  %v536_v38 = vrot.slane %v531_v36, %v535_v35 }
 0x20c   : > { %475 = vadd.xlane.f32.xlu0 %v474_v57 }
 0x299   : > { %v476_v24 = vpop.xlane.xlu0 %475 }
 0x29a   : > { %v477_v25 = vmul.f32 0.0078125, %v476_v24 }
 0x29c   : > { %v478_v26 = vadd.f32 1e-05, %v477_v25 }
 0x29e   : > { %970 = vrsqrt.f32 %v478_v26 }
 0x2a8   : > { %v971_v27 = vpop.eup %970 }
 0x2a9   : > { %v480_v29 = vmul.f32 %v971_v27, %v473_v56 }
 0x2ab   : > { %v488_v31 = vmul.f32 %v762_v28, %v480_v29 }
 0x2ad   : > { %v496_v32 = vadd.f32 %v763_v30, %v488_v31 }
 0x2af   : > { %608 = vmatmul.mubr.f32.vlgmr.msra.gmra.mrb[0].mxu1 %v496_v32 }
 0x382   : > { %v609_v40 = vpop.f32.mrb[0].mxu1 }
 0x383   : > { %v610_v41 = vadd.f32 %v609_v40, %v536_v38  ;;  %v611_v42 = vpop.f32.mrb[1].mxu1 }
 0x384   : > { %v612_v43 = vadd.f32 %v611_v42, %v540_v39 }
 0x385   : > { %614 = vst [vmem:[%s358_s18] sm:$0xff] %v610_v41 }
 0x386   : > { %615 = vst [vmem:[%s358_s18 + $0x8] sm:$0xff] %v612_v43 }
 0x387   : > { %1071 = shalt.err (!%p1068_p11)
}
 0x388   : > { %s1072_s21 = scalar_lea.hbm %s1414_s9, 256  ;;  %s1076_s23 = scalar_lea.hbm %s1470_s7, 512 }
 0x389   : > { %p1073_p0 = scmp.ne.s32.totalorder %s1414_s9, %s1072_s21  ;;  %p1077_p6 = scmp.lt.u32.totalorder %s1414_s9, %s1470_s7 }
 0x38a   : > { %p1078_p7 = scmp.lt.u32.totalorder %s1076_s23, %s1072_s21  ;;  %p1080_p8 = scmp.lt.u32.totalorder %s1072_s21, %s1414_s9 }
 0x38b   : > { %p1074_p4 = pnand %p1073_p0, %p1489_p12 }
 0x38c   : > { %p1079_p2 = por %p1078_p7, %p1077_p6 }
 0x38d   : > { %p1075_p13 = pneg %p1074_p4 }
 0x38e   : > { %p1081_p1 = por %p1080_p8, %p1079_p2 }
 0x390   : > { %p1082_p10 = pnand %p1081_p1, %p1075_p13 }
 0x392   : > { %1085 = shalt.err (!%p1082_p10)
}
 0x393   : > { %888 = dma.vmem_to_hbm [thread:$0]  (%p1489_p12), %s1416_s30, 256, %s1414_s9, %s617_s11  }
 0x394 PF: > { %s1490_s18 = sld [smem:[#allocation13_spill]]  ;;  %s1491_s14 = sld [smem:[#allocation14_spill]] }
 0x395   : > { %p1493_p5 = scmp.ge.s32.totalorder %s1144_s29, 2 }
 0x39a   : > { %s645_s15 = sand.u32 1, %s1490_s18   ;;  %p1492_p3 = scmp.ne.s32.totalorder %s1491_s14, 0 }
 0x39b   : > { %s646_s27 = scalar_lea.sflag [#allocation5], %s645_s15 }
 0x39c   : > { %p902_p9 = pnand %p1493_p5, %p1492_p3 }
 0x39e   : > { %1119 = dma.done.wait (!%p902_p9), %s646_s27, 256  }
 0x39f   : > { %1121 = vsyncadd (!%p902_p9), %s646_s27, 4294967040  ;;  %s24_s29 = sadd.s32 1, %s1144_s29   ;;  %s1494_s24 = smov %s1128_s25 }
 0x3a0   : > { %p21_p11 = scmp.ge.s32.totalorder %s24_s29, 4   ;;  %s1495_s25 = smov %s1132_s26 }
 0x3a1   : > { %s1496_s26 = smov %s1339_s8  ;;  %s1497_s27 = smov %s1140_s28 }
 0x3a2   : > { %s1498_s28 = smov %s1500_s20  ;;  %23 = sbr.rel (!%p21_p11) target bundleno = 7 (0x7), region = 109 }
 0x3a9   :  { %651 = vsyncpa [#allocation4], 1 }
 0x3aa   :  { %653 = vsyncpa [#allocation4 + $0x1], 1 }
 0x3ab   :  { %654 = vsyncpa [#allocation7], 1 }
 0x3ac   :  { %655 = vsyncpa [#allocation5], 1 }
 0x3ad   :  { %657 = vsyncpa [#allocation5 + $0x1], 1 }

// kernel: tpu_custom_call.1
= control target key start
LH: loop header
LB: loop body
LE: loop exit
PB: predicated region body
PF: predicated region fallthrough
CT: control target
= control target key end

     0   :  { %12 = vsyncpa [#allocation4], 0  ;;  %s1463_s0 = inlined_call_operand.hbm [shape: f32[16,128], index: 0, kind: input, shape index: {}]   ;;  %s1464_s1 = inlined_call_operand.hbm [shape: f32[128,128], index: 1, kind: input, shape index: {}]   ;;  %s1465_s2 = inlined_call_operand.vmem [shape: f32[1,128], index: 2, kind: input, shape index: {}]   ;;  %s1466_s3 = inlined_call_operand.vmem [shape: f32[1,128], index: 3, kind: input, shape index: {}]   ;;  %s1467_s4 = inlined_call_operand.vmem [shape: f32[1,128], index: 4, kind: input, shape index: {}]   ;;  %s1468_s5 = inlined_call_operand.hbm [shape: f32[128,256], index: 5, kind: input, shape index: {}]   ;;  %s1469_s6 = inlined_call_operand.vmem [shape: f32[1,256], index: 6, kind: input, shape index: {}]   ;;  %s1470_s7 = inlined_call_operand.hbm [shape: f32[16,256], index: 7, kind: output, shape index: {}]  }
   0x1   :  { %14 = vsyncpa [#allocation4 + $0x1], 0 }
   0x2   :  { %15 = vsyncpa [#allocation7], 0 }
   0x3   :  { %16 = vsyncpa [#allocation5], 0 }
   0x4   :  { %18 = vsyncpa [#allocation5 + $0x1], 0  ;;  %s1197_s24 = smov 0   ;;  %s1199_s25 = smov 0  }
   0x5   :  { %s1201_s26 = smov 0   ;;  %s1203_s27 = smov 0  }
   0x6   :  { %s1205_s28 = smov 0   ;;  %s1207_s29 = smov 0  }
   0x7 LB: > { %1477 = sst [smem:[#allocation13_spill]] %s1124_s24  ;;  %s747_s30 = sadd.s32 4294967295, %s1144_s29   ;;  %s1144_s29 = sphi %s1207_s29, %s24_s29   ;;  %s1140_s28 = sphi %s1205_s28, %s1498_s28   ;;  %s1136_s27 = sphi %s1203_s27, %s1497_s27   ;;  %s1132_s26 = sphi %s1201_s26, %s1496_s26   ;;  %s1128_s25 = sphi %s1199_s25, %s1495_s25   ;;  %s1124_s24 = sphi %s1197_s24, %s1494_s24  }
   0x8   : > { %s748_s8 = sadd.s32 4294967294, %s1144_s29   ;;  %p56_p0 = scmp.ne.s32.totalorder %s1128_s25, %s1124_s24 }
   0x9   : > { %p1231_p1 = scmp.eq.s32.totalorder %s747_s30, 0  ;;  %p1235_p2 = scmp.eq.s32.totalorder %s747_s30, 1 }
   0xa   : > { %p224_p3 = scmp.eq.s32.totalorder %s748_s8, 1  ;;  %p749_p5 = scmp.ge.s32.totalorder %s1144_s29, 1 }
   0xb   : > { %s1478_s9 = scalar_select %p1231_p1, 1, 0 }
   0xc   : > { %p1241_p4 = por %p1231_p1, %p56_p0  ;;  %p1246_p6 = por %p224_p3, %p56_p0 }
   0xd   : > { %p231_p7 = scmp.lt.s32.totalorder %s1144_s29, 3  ;;  %s1146_s14 = smov [#allocation6]  }
   0xe   : > { %s1480_s11 = scalar_select %p1241_p4, 1, 0 }
   0xf   : > { %s1481_s12 = scalar_select %p1246_p6, 1, 0 }
  0x10   : > { %p1251_p8 = pnand %p749_p5, %p231_p7  ;;  %s243_s15 = sshll.u32 %s1146_s14, 4  ;;  %s1255_s15 = int_to_ptr.vmem [resolvable:$true] %s243_s15 }
  0x11   : > { %1482 = sst [smem:[#allocation14_spill]] %s1481_s12  ;;  %s1147_s17 = smov [#allocation8]  }
  0x12   : > { %p890_p9 = pneg %p1251_p8  ;;  %s268_s18 = sshll.u32 %s1147_s17, 4  ;;  %s1266_s18 = int_to_ptr.vmem [resolvable:$true] %s268_s18 }
  0x13   : > { %s972_s21 = scalar_lea.hbm %s1464_s1, 2048 }
  0x14   : > { %p1262_p11 = pnand %p890_p9, %p1231_p1  ;;  %p973_p12 = scmp.ne.s32.totalorder %s1464_s1, %s972_s21 }
  0x15   : > { %p979_p5 = scmp.lt.u32.totalorder %s972_s21, %s1464_s1 }
  0x16   : > { %p974_p13 = pneg %p1262_p11 }
  0x18   : > { %p975_p0 = pnand %p974_p13, %p973_p12 }
  0x1a   : > { %p976_p3 = pneg %p975_p0 }
  0x1c   : > { %p981_p7 = pnand %p979_p5, %p976_p3 }
  0x1e   : > { %984 = shalt.err (!%p981_p7)
}
  0x1f   : > { %s985_s14 = scalar_lea.vmem %s1255_s15, 2048  ;;  %p993_p1 = scmp.lt.s32.totalorder %s1255_s15, %s1255_s15 }
  0x20   : > { %p986_p9 = scmp.ne.s32.totalorder %s1255_s15, %s985_s14  ;;  %p994_p12 = scmp.lt.s32.totalorder %s985_s14, %s985_s14 }
  0x22   : > { %p988_p10 = pnand %p986_p9, %p974_p13  ;;  %p995_p0 = por %p994_p12, %p993_p1 }
  0x24   : > { %p989_p6 = pneg %p988_p10 }
  0x26   : > { %p996_p4 = pnand %p995_p0, %p989_p6 }
  0x28   : > { %999 = shalt.err (!%p996_p4)
}
  0x29   : > { %s1148_s17 = smov 128   ;;  %s1149_s19 = smov 8  }
  0x2a   : > { %893 = dma.hbm_to_vmem [thread:$0]  (!%p1262_p11), %s1464_s1, 2048, %s1255_s15, [#allocation7], %s1148_s17, %s1148_s17, %s1149_s19  }
  0x2b   : > { %s1000_s30 = scalar_lea.hbm %s1468_s5, 4096 }
  0x2c   : > { %p1001_p1 = scmp.ne.s32.totalorder %s1468_s5, %s1000_s30  ;;  %p1007_p10 = scmp.lt.u32.totalorder %s1000_s30, %s1468_s5 }
  0x2e   : > { %p1003_p4 = pnand %p1001_p1, %p974_p13 }
  0x30   : > { %p1004_p6 = pneg %p1003_p4 }
  0x32   : > { %p1009_p3 = pnand %p1007_p10, %p1004_p6 }
  0x34   : > { %1012 = shalt.err (!%p1009_p3)
}
  0x35   : > { %s1013_s15 = scalar_lea.vmem %s1266_s18, 4096  ;;  %p1021_p12 = scmp.lt.s32.totalorder %s1266_s18, %s1266_s18 }
  0x36   : > { %p1014_p5 = scmp.ne.s32.totalorder %s1266_s18, %s1013_s15  ;;  %p1022_p0 = scmp.lt.s32.totalorder %s1013_s15, %s1013_s15 }
  0x38   : > { %p1016_p7 = pnand %p1014_p5, %p974_p13  ;;  %p1023_p1 = por %p1022_p0, %p1021_p12 }
  0x3a   : > { %p1017_p9 = pneg %p1016_p7 }
  0x3c   : > { %p1024_p4 = pnand %p1023_p1, %p1017_p9 }
  0x3e   : > { %1027 = shalt.err (!%p1024_p4)
}
  0x3f   : > { %s1150_s24 = smov 256   ;;  %s1151_s12 = smov 16  }
  0x40   : > { %896 = dma.hbm_to_vmem [thread:$0]  (!%p1262_p11), %s1468_s5, 4096, %s1266_s18, [#allocation7], %s1150_s24, %s1150_s24, %s1151_s12  }
  0x41   : > { %s36_s20 = sadd.s32 1, %s1140_s28  ;;  %s43_s21 = sadd.s32 1, %s1132_s26 }
  0x42   : > { %p38_p13 = scmp.ge.s32.totalorder %s36_s20, 2  ;;  %p50_p6 = scmp.ne.s32.totalorder %s1132_s26, %s1128_s25 }
  0x43   : > { %p51_p10 = scmp.eq.s32.totalorder %s1144_s29, 0  ;;  %p907_p3 = scmp.lt.s32.totalorder %s1144_s29, 2 }
  0x44   : > { %s1500_s20 = smov (%p38_p13, %s36_s20), 0  ;;  %p1330_p7 = por %p1235_p2, %p50_p6 }
  0x45   : > { %p52_p5 = por %p51_p10, %p50_p6  ;;  %s40_s16 = ssub.s32 %s1140_s28, %s1500_s20 }
  0x46   : > { %s1485_s22 = scalar_select %p1330_p7, 1, 0 }
  0x47   : > { %s290_s23 = sand.u32 1, %s1132_s26   ;;  %p41_p9 = scmp.eq.s32.totalorder %s40_s16, 0 }
  0x48   : > { %s754_s18 = sshll.u32 %s290_s23, 3  ;;  %s755_s30 = sshll.u32 %s1140_s28, 7 }
  0x49   : > { %s1339_s8 = scalar_select %p41_p9, %s1132_s26, %s43_s21  }
  0x4a   : > { %s1344_s24 = scalar_lea.hbm %s1463_s0, %s755_s30  ;;  %s294_s10 = scalar_lea.vmem [#allocation3], %s754_s18 }
  0x4b   : > { %s301_s12 = sshll.u32 %s294_s10, 4  ;;  %p1348_p2 = pnand %p907_p3, %p52_p5  ;;  %s1352_s12 = int_to_ptr.vmem [resolvable:$true] %s301_s12 }
  0x4c   : > { %s291_s19 = scalar_lea.sflag [#allocation4], %s290_s23  ;;  %s1028_s21 = scalar_lea.hbm %s1344_s24, 128 }
  0x4d   : > { %p1029_p11 = scmp.ne.s32.totalorder %s1344_s24, %s1028_s21  ;;  %p1030_p12 = pneg %p1348_p2 }
  0x4e   : > { %s1033_s30 = scalar_lea.hbm %s1463_s0, 256  ;;  %p1034_p4 = scmp.lt.u32.totalorder %s1344_s24, %s1463_s0 }
  0x4f   : > { %p1031_p0 = pnand %p1030_p12, %p1029_p11  ;;  %p1035_p13 = scmp.lt.u32.totalorder %s1033_s30, %s1028_s21 }
  0x50   : > { %p1037_p10 = scmp.lt.u32.totalorder %s1028_s21, %s1344_s24 }
  0x51   : > { %p1032_p1 = pneg %p1031_p0  ;;  %p1036_p6 = por %p1035_p13, %p1034_p4 }
  0x53   : > { %p1038_p3 = por %p1037_p10, %p1036_p6 }
  0x55   : > { %p1039_p5 = pnand %p1038_p3, %p1032_p1 }
  0x57   : > { %1042 = shalt.err (!%p1039_p5)
}
  0x58   : > { %s1043_s23 = scalar_lea.vmem %s1352_s12, 128  ;;  %s1152_s10 = smov [#allocation3]  }
  0x59   : > { %p1044_p9 = scmp.ne.s32.totalorder %s1352_s12, %s1043_s23  ;;  %s1048_s16 = sshll.u32 %s1152_s10, 4  ;;  %s1049_s16 = int_to_ptr.vmem [resolvable:$false] %s1048_s16 }
  0x5a   : > { %s1050_s18 = scalar_lea.vmem %s1049_s16, 256  ;;  %p1051_p7 = scmp.lt.s32.totalorder %s1352_s12, %s1049_s16 }
  0x5b   : > { %p1046_p11 = pnand %p1044_p9, %p1030_p12  ;;  %p1052_p4 = scmp.lt.s32.totalorder %s1050_s18, %s1043_s23 }
  0x5d   : > { %p1047_p0 = pneg %p1046_p11  ;;  %p1053_p13 = por %p1052_p4, %p1051_p7 }
  0x5f   : > { %p1054_p6 = pnand %p1053_p13, %p1047_p0 }
  0x61   : > { %1057 = shalt.err (!%p1054_p6)
}
  0x62   : > { %900 = dma.hbm_to_vmem [thread:$0]  (!%p1348_p2), %s1344_s24, 128, %s1352_s12, %s291_s19  }
  0x63   : > { %310 = sbr.rel (%p1251_p8) target bundleno = 916 (0x394), region = 48  ;;  %s1382_s21 = sand.u32 (!%p1251_p8), 1, %s1128_s25  }
  0x64   : > { %s757_s30 = sshll.u32 (!%p1251_p8), %s1382_s21, 3  ;;  %s313_s14 = scalar_lea.sflag (!%p1251_p8), [#allocation4], %s1382_s21 }
  0x65   : > { %s1386_s15 = scalar_lea.vmem (!%p1251_p8), [#allocation3], %s757_s30  ;;  %p1487_p7 = scmp.ne.s32.totalorder (!%p1251_p8), %s1480_s11, 0 }
  0x6a   : > { %1111 = dma.done.wait (%p1487_p7), %s313_s14, 128  }
  0x6b   : > { %1113 = vsyncadd (%p1487_p7), %s313_s14, 4294967168  ;;  %p1488_p2 = scmp.ne.s32.totalorder %s1478_s9, 0 }
  0x6d   : > { %1115 = dma.done.wait (%p1488_p2), [#allocation7], 6144  }
  0x6e   : > { %1117 = vsyncadd (%p1488_p2), [#allocation7], 4294961152  ;;  %v1153_v0 = vmov 0.0|0.0   ;;  %vm1154_vm0 = vmmov 0   ;;  %v1155_v1 = vmov 0.0   ;;  %v371_v2 = vld [vmem:[#allocation6] sm:$0xff] }
  0x6f   : > { %822 = vmatprep.subr.bf16.mxu0 %v1153_v0  ;;  %819 = vmatprep.mubr.msk.f32.mxu0 %vm1154_vm0, %v1155_v1  ;;  %v372_v3 = vld [vmem:[#allocation6 + $0x8] sm:$0xff]  ;;  %v373_v4 = vld [vmem:[#allocation6 + $0x10] sm:$0xff]  ;;  %v374_v6 = vld [vmem:[#allocation6 + $0x18] sm:$0xff]  ;;  %s760_s19 = sshll.u32 %s1382_s21, 4  ;;  %s769_s16 = sshll.u32 %s1136_s27, 8 }
  0x70   : > { %607 = vmatprep.mubr.f32.mxu1 %v1155_v1  ;;  %v823_v5 = vpack.c.bf16 %v372_v3, %v371_v2  ;;  %v826_v7 = vpack.c.bf16 %v374_v6, %v373_v4  ;;  %v375_v8 = vld [vmem:[#allocation6 + $0x20] sm:$0xff]  ;;  %v376_v9 = vld [vmem:[#allocation6 + $0x28] sm:$0xff]  ;;  %v377_v11 = vld [vmem:[#allocation6 + $0x30] sm:$0xff]  ;;  %s358_s18 = scalar_lea.vmem [#allocation9], %s760_s19  ;;  %s1414_s9 = scalar_lea.hbm %s1470_s7, %s769_s16 }
  0x71   : > { %v829_v10 = vpack.c.bf16 %v376_v9, %v375_v8  ;;  %v378_v12 = vld [vmem:[#allocation6 + $0x38] sm:$0xff]  ;;  %v379_v14 = vld [vmem:[#allocation6 + $0x40] sm:$0xff]  ;;  %v380_v15 = vld [vmem:[#allocation6 + $0x48] sm:$0xff]  ;;  %s633_s30 = sshll.u32 %s358_s18, 4  ;;  %s617_s11 = scalar_lea.sflag [#allocation5], %s1382_s21  ;;  %s1416_s30 = int_to_ptr.vmem [resolvable:$true] %s633_s30 }
  0x72   : > { %824 = vmatpush3.bf16.msra.mxu0 %v823_v5  ;;  %v832_v13 = vpack.c.bf16 %v378_v12, %v377_v11  ;;  %v835_v16 = vpack.c.bf16 %v380_v15, %v379_v14  ;;  %v381_v17 = vld [vmem:[#allocation6 + $0x50] sm:$0xff]  ;;  %v382_v18 = vld [vmem:[#allocation6 + $0x58] sm:$0xff]  ;;  %v383_v20 = vld [vmem:[#allocation6 + $0x60] sm:$0xff]  ;;  %s1058_s27 = scalar_lea.vmem %s1416_s30, 256  ;;  %p1489_p12 = scmp.ne.s32.totalorder %s1485_s22, 0 }
  0x73   : > { %825 = vmatprep.subr.bf16.mxu0 %v1153_v0  ;;  %v838_v19 = vpack.c.bf16 %v382_v18, %v381_v17  ;;  %v384_v21 = vld [vmem:[#allocation6 + $0x68] sm:$0xff]  ;;  %v385_v23 = vld [vmem:[#allocation6 + $0x70] sm:$0xff]  ;;  %v386_v24 = vld [vmem:[#allocation6 + $0x78] sm:$0xff]  ;;  %p1059_p8 = scmp.ne.s32.totalorder %s1416_s30, %s1058_s27  ;;  %s1156_s13 = smov [#allocation9]  }
  0x74   : > { %v841_v22 = vpack.c.bf16 %v384_v21, %v383_v20  ;;  %v844_v25 = vpack.c.bf16 %v386_v24, %v385_v23  ;;  %v370_v26 = vld [vmem:[%s1386_s15] sm:$0xff]  ;;  %v500_v36 = vld [vmem:[#allocation8 + $0x8] sm:$0xff]  ;;  %v499_v38 = vld [vmem:[#allocation8] sm:$0xff]  ;;  %s1062_s24 = sshll.u32 %s1156_s13, 4  ;;  %s1063_s24 = int_to_ptr.vmem [resolvable:$false] %s1062_s24 }
  0x75   : > { %v761_v27 = vld [vmem:[%s1465_s2] ss:$0 sm:$0xff]  ;;  %v502_v37 = vld [vmem:[#allocation8 + $0x18] sm:$0xff]  ;;  %v504_v41 = vld [vmem:[#allocation8 + $0x28] sm:$0xff]  ;;  %p1060_p1 = pnand %p1059_p8, %p1489_p12  ;;  %s1064_s12 = scalar_lea.vmem %s1063_s24, 512 }
  0x76   : > { %827 = vmatpush3.bf16.msra.mxu0 %v826_v7  ;;  %v846_v39 = vpack.c.bf16 %v502_v37, %v500_v36  ;;  %v501_v40 = vld [vmem:[#allocation8 + $0x10] sm:$0xff]  ;;  %v506_v42 = vld [vmem:[#allocation8 + $0x38] sm:$0xff]  ;;  %v503_v45 = vld [vmem:[#allocation8 + $0x20] sm:$0xff]  ;;  %p1065_p3 = scmp.lt.s32.totalorder %s1416_s30, %s1063_s24  ;;  %p1066_p5 = scmp.lt.s32.totalorder %s1064_s12, %s1058_s27 }
  0x77   : > { %828 = vmatprep.subr.bf16.mxu0 %v1153_v0  ;;  %v848_v43 = vpack.c.bf16 %v501_v40, %v499_v38  ;;  %v850_v44 = vpack.c.bf16 %v506_v42, %v504_v41  ;;  %v505_v46 = vld [vmem:[#allocation8 + $0x30] sm:$0xff]  ;;  %v508_v47 = vld [vmem:[#allocation8 + $0x48] sm:$0xff]  ;;  %v510_v48 = vld [vmem:[#allocation8 + $0x58] sm:$0xff]  ;;  %p1061_p10 = pneg %p1060_p1 }
  0x78   : > { %847 = vmatprep.subr.bf16.mxu1 %v846_v39  ;;  %v852_v49 = vpack.c.bf16 %v505_v46, %v503_v45  ;;  %v854_v50 = vpack.c.bf16 %v510_v48, %v508_v47  ;;  %v507_v51 = vld [vmem:[#allocation8 + $0x40] sm:$0xff]  ;;  %v509_v52 = vld [vmem:[#allocation8 + $0x50] sm:$0xff]  ;;  %v512_v58 = vld [vmem:[#allocation8 + $0x68] sm:$0xff]  ;;  %p1067_p9 = por %p1066_p5, %p1065_p3 }
  0x79   : > { %849 = vmatpush1.bf16.msra.mxu1 %v848_v43  ;;  %v856_v53 = vpack.c.bf16 %v509_v52, %v507_v51  ;;  %v514_v59 = vld [vmem:[#allocation8 + $0x78] sm:$0xff]  ;;  %v511_v61 = vld [vmem:[#allocation8 + $0x60] sm:$0xff]  ;;  %v513_v62 = vld [vmem:[#allocation8 + $0x70] sm:$0xff] }
  0x7a   : > { %830 = vmatpush3.bf16.msra.mxu0 %v829_v10  ;;  %851 = vmatprep.subr.bf16.mxu1 %v850_v44  ;;  %v858_v60 = vpack.c.bf16 %v514_v59, %v512_v58  ;;  %v860_v63 = vpack.c.bf16 %v513_v62, %v511_v61  ;;  %v518_v1 = vld [vmem:[#allocation8 + $0x98] sm:$0xff]  ;;  %v515_v3 = vld [vmem:[#allocation8 + $0x80] sm:$0xff]  ;;  %v517_v4 = vld [vmem:[#allocation8 + $0x90] sm:$0xff]  ;;  %p1068_p11 = pnand %p1067_p9, %p1061_p10 }
  0x7b   : > { %831 = vmatprep.subr.bf16.mxu0 %v1153_v0  ;;  %v864_v5 = vpack.c.bf16 %v517_v4, %v515_v3  ;;  %v520_v6 = vld [vmem:[#allocation8 + $0xa8] sm:$0xff]  ;;  %v522_v7 = vld [vmem:[#allocation8 + $0xb8] sm:$0xff]  ;;  %v519_v8 = vld [vmem:[#allocation8 + $0xa0] sm:$0xff] }
  0x7c   : > { %v866_v9 = vpack.c.bf16 %v522_v7, %v520_v6  ;;  %v521_v10 = vld [vmem:[#allocation8 + $0xb0] sm:$0xff]  ;;  %v524_v11 = vld [vmem:[#allocation8 + $0xc8] sm:$0xff]  ;;  %v526_v12 = vld [vmem:[#allocation8 + $0xd8] sm:$0xff] }
  0x7d   : > { %853 = vmatpush1.bf16.msra.mxu1 %v852_v49  ;;  %v870_v14 = vpack.c.bf16 %v526_v12, %v524_v11  ;;  %v523_v15 = vld [vmem:[#allocation8 + $0xc0] sm:$0xff]  ;;  %v528_v17 = vld [vmem:[#allocation8 + $0xe8] sm:$0xff]  ;;  %v530_v18 = vld [vmem:[#allocation8 + $0xf8] sm:$0xff] }
  0x7e   : > { %833 = vmatpush3.bf16.msra.mxu0 %v832_v13  ;;  %855 = vmatprep.subr.bf16.mxu1 %v854_v50  ;;  %v868_v13 = vpack.c.bf16 %v521_v10, %v519_v8  ;;  %v874_v20 = vpack.c.bf16 %v530_v18, %v528_v17  ;;  %v527_v21 = vld [vmem:[#allocation8 + $0xe0] sm:$0xff]  ;;  %v531_v36 = vld [vmem:[%s1469_s6] sm:$0x3] }
  0x7f   : > { %834 = vmatprep.subr.bf16.mxu0 %v1153_v0 }
  0x81   : > { %857 = vmatpush1.bf16.msra.mxu1 %v856_v53 }
  0x82   : > { %836 = vmatpush3.bf16.msra.mxu0 %v835_v16  ;;  %859 = vmatprep.subr.bf16.mxu1 %v858_v60  ;;  %v525_v16 = vld [vmem:[#allocation8 + $0xd0] sm:$0xff] }
  0x83   : > { %837 = vmatprep.subr.bf16.mxu0 %v1153_v0 }
  0x85   : > { %861 = vmatpush1.bf16.msra.mxu1 %v860_v63 }
  0x86   : > { %839 = vmatpush3.bf16.msra.mxu0 %v838_v19  ;;  %v872_v19 = vpack.c.bf16 %v525_v16, %v523_v15 }
  0x87   : > { %840 = vmatprep.subr.bf16.mxu0 %v1153_v0 }
  0x8a   : > { %842 = vmatpush3.bf16.msra.mxu0 %v841_v22  ;;  %v529_v22 = vld [vmem:[#allocation8 + $0xf0] sm:$0xff] }
  0x8b   : > { %843 = vmatprep.subr.bf16.mxu0 %v1153_v0  ;;  %v516_v0 = vld [vmem:[#allocation8 + $0x88] sm:$0xff]  ;;  %v876_v23 = vpack.c.bf16 %v529_v22, %v527_v21 }
  0x8c   : > { %v862_v2 = vpack.c.bf16 %v518_v1, %v516_v0 }
  0x8e   : > { %845 = vmatpush3.bf16.msra.mxu0 %v844_v25  ;;  %863 = vmatprep.subr.bf16.mxu1 %v862_v2 }
  0x8f   : > { %865 = vmatpush1.bf16.msra.mxu1 %v864_v5 }
  0x90   : > { %867 = vmatprep.subr.bf16.mxu1 %v866_v9 }
  0x91   : > { %820 = vmatmul.mubr.f32.vlgmr.msra.gmra.mrb[0].mxu0 %v370_v26 }
  0x93   : > { %869 = vmatpush1.bf16.msra.mxu1 %v868_v13 }
  0x94   : > { %871 = vmatprep.subr.bf16.mxu1 %v870_v14 }
  0x97   : > { %873 = vmatpush1.bf16.msra.mxu1 %v872_v19 }
  0x98   : > { %875 = vmatprep.subr.bf16.mxu1 %v874_v20 }
  0x9b   : > { %877 = vmatpush1.bf16.msra.mxu1 %v876_v23 }
 0x164   : > { %v460_v28 = vpop.f32.mrb[0].mxu0 }
 0x165   : > { %v461_v29 = vadd.f32 %v761_v27, %v460_v28  ;;  %v821_v30 = vpop.f32.mrb[1].mxu0  ;;  %v762_v28 = vld [vmem:[%s1466_s3] ss:$0 sm:$0xff] }
 0x166   : > { %v763_v30 = vld [vmem:[%s1467_s4] ss:$0 sm:$0xff] }
 0x167   : > { %v465_v31 = vmul.f32 0.70710677, %v461_v29  ;;  %v464_v33 = vmul.f32 0.5, %v461_v29 }
 0x169   : > { %968 = verf.f32 %v465_v31 }
 0x173   : > { %v969_v32 = vpop.eup %968 }
 0x174   : > { %v467_v34 = vadd.f32 1.0, %v969_v32 }
 0x176   : > { %v468_v35 = vmul.f32 %v467_v34, %v464_v33  ;;  %v533_v33 = vlaneseq }
 0x178   : > { %469 = vadd.xlane.f32.xlu0 %v468_v35  ;;  %v534_v34 = vshrl.u32 %v533_v33, 7 }
 0x17a   : > { %v539_v37 = vsub.s32 1, %v534_v34 }
 0x17c   : > { %v540_v39 = vrot.slane %v531_v36, %v539_v37 }
 0x205   : > { %v470_v54 = vpop.xlane.xlu0 %469 }
 0x206   : > { %v472_v55 = vmul.f32 0.0078125, %v470_v54 }
 0x208   : > { %v473_v56 = vsub.f32 %v468_v35, %v472_v55  ;;  %v535_v35 = vsub.s32 0, %v534_v34 }
 0x20a   : > { %v474_v57 = vmul.f32 %v473_v56, %v473_v56  ;;  %v536_v38 = vrot.slane %v531_v36, %v535_v35 }
 0x20c   : > { %475 = vadd.xlane.f32.xlu0 %v474_v57 }
 0x299   : > { %v476_v24 = vpop.xlane.xlu0 %475 }
 0x29a   : > { %v477_v25 = vmul.f32 0.0078125, %v476_v24 }
 0x29c   : > { %v478_v26 = vadd.f32 1e-05, %v477_v25 }
 0x29e   : > { %970 = vrsqrt.f32 %v478_v26 }
 0x2a8   : > { %v971_v27 = vpop.eup %970 }
 0x2a9   : > { %v480_v29 = vmul.f32 %v971_v27, %v473_v56 }
 0x2ab   : > { %v488_v31 = vmul.f32 %v762_v28, %v480_v29 }
 0x2ad   : > { %v496_v32 = vadd.f32 %v763_v30, %v488_v31 }
 0x2af   : > { %608 = vmatmul.mubr.f32.vlgmr.msra.gmra.mrb[0].mxu1 %v496_v32 }
 0x382   : > { %v609_v40 = vpop.f32.mrb[0].mxu1 }
 0x383   : > { %v610_v41 = vadd.f32 %v609_v40, %v536_v38  ;;  %v611_v42 = vpop.f32.mrb[1].mxu1 }
 0x384   : > { %v612_v43 = vadd.f32 %v611_v42, %v540_v39 }
 0x385   : > { %614 = vst [vmem:[%s358_s18] sm:$0xff] %v610_v41 }
 0x386   : > { %615 = vst [vmem:[%s358_s18 + $0x8] sm:$0xff] %v612_v43 }
 0x387   : > { %1071 = shalt.err (!%p1068_p11)
}
 0x388   : > { %s1072_s21 = scalar_lea.hbm %s1414_s9, 256  ;;  %s1076_s23 = scalar_lea.hbm %s1470_s7, 512 }
 0x389   : > { %p1073_p0 = scmp.ne.s32.totalorder %s1414_s9, %s1072_s21  ;;  %p1077_p6 = scmp.lt.u32.totalorder %s1414_s9, %s1470_s7 }
 0x38a   : > { %p1078_p7 = scmp.lt.u32.totalorder %s1076_s23, %s1072_s21  ;;  %p1080_p8 = scmp.lt.u32.totalorder %s1072_s21, %s1414_s9 }
 0x38b   : > { %p1074_p4 = pnand %p1073_p0, %p1489_p12 }
 0x38c   : > { %p1079_p2 = por %p1078_p7, %p1077_p6 }
 0x38d   : > { %p1075_p13 = pneg %p1074_p4 }
 0x38e   : > { %p1081_p1 = por %p1080_p8, %p1079_p2 }
 0x390   : > { %p1082_p10 = pnand %p1081_p1, %p1075_p13 }
 0x392   : > { %1085 = shalt.err (!%p1082_p10)
}
 0x393   : > { %888 = dma.vmem_to_hbm [thread:$0]  (%p1489_p12), %s1416_s30, 256, %s1414_s9, %s617_s11  }
 0x394 PF: > { %s1490_s18 = sld [smem:[#allocation13_spill]]  ;;  %s1491_s14 = sld [smem:[#allocation14_spill]] }
 0x395   : > { %p1493_p5 = scmp.ge.s32.totalorder %s1144_s29, 2 }
 0x39a   : > { %s645_s15 = sand.u32 1, %s1490_s18   ;;  %p1492_p3 = scmp.ne.s32.totalorder %s1491_s14, 0 }
 0x39b   : > { %s646_s27 = scalar_lea.sflag [#allocation5], %s645_s15 }
 0x39c   : > { %p902_p9 = pnand %p1493_p5, %p1492_p3 }
 0x39e   : > { %1119 = dma.done.wait (!%p902_p9), %s646_s27, 256  }
 0x39f   : > { %1121 = vsyncadd (!%p902_p9), %s646_s27, 4294967040  ;;  %s24_s29 = sadd.s32 1, %s1144_s29   ;;  %s1494_s24 = smov %s1128_s25 }
 0x3a0   : > { %p21_p11 = scmp.ge.s32.totalorder %s24_s29, 4   ;;  %s1495_s25 = smov %s1132_s26 }
 0x3a1   : > { %s1496_s26 = smov %s1339_s8  ;;  %s1497_s27 = smov %s1140_s28 }
 0x3a2   : > { %s1498_s28 = smov %s1500_s20  ;;  %23 = sbr.rel (!%p21_p11) target bundleno = 7 (0x7), region = 109 }
 0x3a9   :  { %651 = vsyncpa [#allocation4], 1 }
 0x3aa   :  { %653 = vsyncpa [#allocation4 + $0x1], 1 }
 0x3ab   :  { %654 = vsyncpa [#allocation7], 1 }
 0x3ac   :  { %655 = vsyncpa [#allocation5], 1 }
 0x3ad   :  { %657 = vsyncpa [#allocation5 + $0x1], 1 }

</bundles_post_ra>
